<compile_context>
chip_gen: v5e
topology: v5e:2x2
jax: 0.10.0
libtpu: 0.0.40
codegen_flags: <defaults>
</compile_context>

<pallas_src>
import jax
import jax.numpy as jnp
from jax.experimental import pallas as pl
from jax.experimental.pallas import tpu as pltpu


def _silu(x):
    return x * jax.nn.sigmoid(x)


def _round_up(x, m):
    return (x + m - 1) // m * m


def _pick_tile(n, target, quantum=8, min_steps=2):
    """Row-tile size: multiple of `quantum` (or == n for tiny n), capped so
    the 1-D grid keeps >= min_steps steps when n allows (v7x megacore)."""
    if n <= quantum:
        return max(n, 1)
    cap = _round_up(pl.cdiv(n, min_steps), quantum)      # keep >= min_steps
    tile = min(_round_up(target, quantum), max(cap, quantum))
    tile = min(tile, (n // quantum) * quantum)           # never exceed n
    return max(tile, quantum)


# ---------------------------------------------------------------------------
# Kernel 1: node tile -> (hW0 [tn, sdim], atoms|coords slab [tn, 16])
#   h          = SiLU(s @ Ws + bs)            (shared_mapping)
#   hW0        = h @ W0f                      (pre-projection for edge path)
#   atoms      = h @ Wa + ba                  (slab cols [0:naf])
#   coords_raw = p + coords_lin(v)            (slab cols [naf:naf+3], via
#                                              block-diag weight on [v_flat|p])
# ---------------------------------------------------------------------------
def node_kernel(s_ref, vp_ref, ws_ref, bs_ref, w0f_ref, wa_ref, ba_ref,
                wcp_ref, hw_ref, ac_ref):
    pre = (jnp.dot(s_ref[...], ws_ref[...], preferred_element_type=jnp.float32)
           + bs_ref[...])
    h = _silu(pre)                                   # f32
    hc = h.astype(w0f_ref.dtype)
    hw_ref[...] = jnp.dot(hc, w0f_ref[...],
                          preferred_element_type=jnp.float32).astype(hw_ref.dtype)
    ac_ref[...] = (jnp.dot(hc, wa_ref[...], preferred_element_type=jnp.float32)
                   + ba_ref[...]
                   + jnp.dot(vp_ref[...], wcp_ref[...],
                             preferred_element_type=jnp.float32))


# ---------------------------------------------------------------------------
# Kernel 2: edge tile -> bonds (8-lane slab)
#   In-kernel gather from the VMEM-resident node table via one-hot matmuls:
#     gi, gj  -> (h@W0f)_i/(h@W0f)_j and centred coords c_i/c_j
#   d   = ||c_i - c_j||^2
#   h0  = SiLU((hW0_i + hW0_j) + e_sym @ (Wb@W0f) + d*w0d + (bb@W0f + b0))
#   out = h0 @ W1 + b1
# ---------------------------------------------------------------------------
def edge_kernel(idx_ref, esym_ref, table_ref, wbf_ref, w0d_ref, b0_ref,
                w1_ref, b1_ref, out_ref):
    table = table_ref[...]                            # [N, sdim+3] resident
    sdim = table.shape[-1] - 3
    idx = idx_ref[...]                                # [te, 2] int32 (i, j)
    te = idx.shape[0]
    col = jax.lax.broadcasted_iota(jnp.int32, (te, table.shape[0]), 1)
    one = jnp.ones((), table.dtype)
    zero = jnp.zeros((), table.dtype)
    sel_i = jnp.where(col == idx[:, 0:1], one, zero)  # [te, N] one-hot
    sel_j = jnp.where(col == idx[:, 1:2], one, zero)
    gi = jnp.dot(sel_i, table, preferred_element_type=jnp.float32)
    gj = jnp.dot(sel_j, table, preferred_element_type=jnp.float32)
    hw_sum = gi[:, :sdim] + gj[:, :sdim]              # (h_i + h_j) @ W0f
    cdiff = gi[:, sdim:] - gj[:, sdim:]               # c_i - c_j
    d = jnp.sum(cdiff * cdiff, axis=-1, keepdims=True)
    pre = (hw_sum
           + jnp.dot(esym_ref[...], wbf_ref[...],
                     preferred_element_type=jnp.float32)
           + d * w0d_ref[...] + b0_ref[...])
    h0 = _silu(pre)
    out_ref[...] = (jnp.dot(h0.astype(w1_ref.dtype), w1_ref[...],
                            preferred_element_type=jnp.float32)
                    + b1_ref[...])


# ---------------------------------------------------------------------------
# Wrapper
# ---------------------------------------------------------------------------
def prediction_head_edge(params, s, v, p, e, batch, edge_index, num_graphs,
                         *, node_tile=1024, edge_tile=2048,
                         compute_dtype=jnp.float32):
    N, sdim = s.shape
    E, edge_dim = e.shape
    vdim = v.shape[-1]
    naf = params["Wa"].shape[1]
    nb = params["W1"].shape[1]
    f32 = jnp.float32
    cdt = compute_dtype
    quantum = 8 * (4 // jnp.dtype(cdt).itemsize)      # 8 for f32, 16 for bf16

    AC = 16                       # atoms|coords slab lanes
    NB = 8                        # bonds slab lanes
    assert naf + 3 <= AC and nb <= NB

    # ---- weight packing / folding (tiny, built once per call) -------------
    wa = jnp.zeros((sdim, AC), f32).at[:, :naf].set(params["Wa"])
    ba = jnp.zeros((1, AC), f32).at[:, :naf].set(params["ba"])
    wc = params["wc"].reshape(vdim)
    wcp = jnp.zeros((3 * vdim + 3, AC), f32)
    for a in range(3):            # block-diag coords_lin + identity rows for p
        wcp = wcp.at[a * vdim:(a + 1) * vdim, naf + a].set(wc)
        wcp = wcp.at[3 * vdim + a, naf + a].set(1.0)
    w0f = params["W0f"]
    wbf = params["Wb"] @ w0f                          # bond_mapping folded in
    b0f = params["bb"] @ w0f + params["b0"]
    w1 = jnp.zeros((sdim, NB), f32).at[:, :nb].set(params["W1"])
    b1 = jnp.zeros((1, NB), f32).at[:, :nb].set(params["b1"])

    cparams = pltpu.CompilerParams(
        dimension_semantics=("parallel",),
        vmem_limit_bytes=32 * 1024 * 1024)

    # ---------------- node kernel: 1-D parallel grid over N ----------------
    vp = jnp.concatenate([v.reshape(N, 3 * vdim), p], axis=-1)   # [N, 3v+3]
    tn = _pick_tile(N, node_tile, quantum)
    hw0, ac = pl.pallas_call(
        node_kernel,
        out_shape=(jax.ShapeDtypeStruct((N, sdim), cdt),
                   jax.ShapeDtypeStruct((N, AC), f32)),
        grid=(pl.cdiv(N, tn),),
        in_specs=[
            pl.BlockSpec((tn, sdim), lambda i: (i, 0)),
            pl.BlockSpec((tn, 3 * vdim + 3), lambda i: (i, 0)),
            pl.BlockSpec((sdim, sdim), lambda i: (0, 0)),
            pl.BlockSpec((1, sdim), lambda i: (0, 0)),
            pl.BlockSpec((sdim, sdim), lambda i: (0, 0)),
            pl.BlockSpec((sdim, AC), lambda i: (0, 0)),
            pl.BlockSpec((1, AC), lambda i: (0, 0)),
            pl.BlockSpec((3 * vdim + 3, AC), lambda i: (0, 0)),
        ],
        out_specs=(pl.BlockSpec((tn, sdim), lambda i: (i, 0)),
                   pl.BlockSpec((tn, AC), lambda i: (i, 0))),
        compiler_params=cparams,
    )(s.astype(cdt), vp.astype(cdt), params["Ws"].astype(cdt), params["bs"],
      w0f.astype(cdt), wa.astype(cdt), ba, wcp.astype(cdt))

    atoms_pred = ac[:, :naf]
    coords_raw = ac[:, naf:naf + 3]

    # Per-graph mean subtraction: linear segment reduction with empty-graph
    # guard (reference would NaN on an empty graph; guard is intentional).
    sums = jax.ops.segment_sum(coords_raw, batch, num_segments=num_graphs)
    counts = jax.ops.segment_sum(jnp.ones((N,), f32), batch,
                                 num_segments=num_graphs)
    means = sums / jnp.maximum(counts, 1.0)[:, None]
    coords_pred = coords_raw - means[batch]

    if E == 0:                    # guard: no edges -> empty bonds output
        return {"coords_pred": coords_pred, "atoms_pred": atoms_pred,
                "bonds_pred": jnp.zeros((0, nb), f32)}

    # ---------------- edge-side glue (data-dependent indexing) -------------
    j_idx, i_idx = edge_index[0], edge_index[1]

    # Reverse-edge permutation symmetrisation (O(E log E)); missing reverse
    # edges contribute 0, matching the dense-zero reference behaviour.
    # TODO(synk): duplicate (j,i) edges resolve to the first sorted duplicate
    # (the dense .set kept the last); int32 keys assume N*N < 2**31.
    key = j_idx * N + i_idx
    rkey = i_idx * N + j_idx
    order = jnp.argsort(key)
    skey = key[order]
    pos = jnp.minimum(jnp.searchsorted(skey, rkey), E - 1)
    rev = order[pos]
    has_rev = skey[pos] == rkey
    e_sym = 0.5 * (e + jnp.where(has_rev[:, None], e[rev], 0.0))

    # VMEM-resident node table for the in-kernel gather:
    #   cols [0:sdim] = h @ W0f (pre-projected), cols [sdim:sdim+3] = coords.
    table = jnp.concatenate([hw0.astype(cdt), coords_pred.astype(cdt)], axis=-1)
    eidx = jnp.stack([i_idx, j_idx], axis=-1).astype(jnp.int32)   # [E, 2]

    # ---------------- edge kernel: 1-D parallel grid over E ----------------
    te = _pick_tile(E, edge_tile, quantum)
    bonds = pl.pallas_call(
        edge_kernel,
        out_shape=jax.ShapeDtypeStruct((E, NB), f32),
        grid=(pl.cdiv(E, te),),
        in_specs=[
            pl.BlockSpec((te, 2), lambda t: (t, 0)),
            pl.BlockSpec((te, edge_dim), lambda t: (t, 0)),
            pl.BlockSpec((N, sdim + 3), lambda t: (0, 0)),   # resident table
            pl.BlockSpec((edge_dim, sdim), lambda t: (0, 0)),
            pl.BlockSpec((1, sdim), lambda t: (0, 0)),
            pl.BlockSpec((1, sdim), lambda t: (0, 0)),
            pl.BlockSpec((sdim, NB), lambda t: (0, 0)),
            pl.BlockSpec((1, NB), lambda t: (0, 0)),
        ],
        out_specs=pl.BlockSpec((te, NB), lambda t: (t, 0)),
        compiler_params=cparams,
    )(eidx, e_sym.astype(cdt), table, wbf.astype(cdt), params["w0d"], b0f,
      w1.astype(cdt), b1)

    return {"coords_pred": coords_pred,
            "atoms_pred": atoms_pred,
            "bonds_pred": bonds[:, :nb]}


# ---------------------------------------------------------------------------
# Pure-JAX reference (mirrors the PyTorch forward, default branch)
# ---------------------------------------------------------------------------
def reference(params, s, v, p, e, batch, edge_index, num_graphs):
    h = jax.nn.silu(s @ params["Ws"] + params["bs"])
    atoms = h @ params["Wa"] + params["ba"]
    cp = jnp.sum(v * params["wc"].reshape(1, 1, -1), axis=-1)
    coords = p + cp
    sums = jax.ops.segment_sum(coords, batch, num_segments=num_graphs)
    counts = jax.ops.segment_sum(jnp.ones((coords.shape[0], 1)), batch,
                                 num_segments=num_graphs)
    coords = coords - (sums / counts)[batch]
    j_idx, i_idx = edge_index[0], edge_index[1]
    d = jnp.sum((coords[i_idx] - coords[j_idx]) ** 2, axis=-1, keepdims=True)
    N, C = s.shape[0], e.shape[-1]
    e_dense = jnp.zeros((N, N, C)).at[j_idx, i_idx, :].set(e)
    e_dense = 0.5 * (e_dense + jnp.transpose(e_dense, (1, 0, 2)))
    e_sym = e_dense[j_idx, i_idx, :]
    f = h[i_idx] + h[j_idx] + e_sym @ params["Wb"] + params["bb"]
    edge = jnp.concatenate([f, d], axis=-1)
    W0 = jnp.concatenate([params["W0f"], params["w0d"]], axis=0)
    h0 = jax.nn.silu(edge @ W0 + params["b0"])
    bonds = h0 @ params["W1"] + params["b1"]
    return coords, atoms, bonds


def _fc_edges(batch):
    """Fully-connected (no self-loop) per-graph edges; row0=j (src), row1=i."""
    n = batch.shape[0]
    b = [int(x) for x in batch]
    src, dst = [], []
    for a in range(n):
        for c in range(n):
            if a != c and b[a] == b[c]:
                src.append(a)
                dst.append(c)
    return jnp.array([src, dst], dtype=jnp.int32)


if __name__ == "__main__":
    sdim, vdim = 32, 16            # hn_dim
    edge_dim = 16
    num_atom_features = 10
    num_bond_types = 5

    key = jax.random.PRNGKey(0)
    ks = jax.random.split(key, 16)

    def init(k, shape, scale=0.2):
        return scale * jax.random.normal(k, shape, dtype=jnp.float32)

    params = {
        "Ws": init(ks[0], (sdim, sdim)),           # shared_mapping (in, out)
        "bs": init(ks[1], (1, sdim)),
        "Wa": init(ks[2], (sdim, num_atom_features)),
        "ba": init(ks[3], (1, num_atom_features)),
        "wc": init(ks[4], (1, vdim)),              # coords_lin, no bias
        "Wb": init(ks[5], (edge_dim, sdim)),       # bond_mapping
        "bb": init(ks[6], (1, sdim)),
        "W0f": init(ks[7], (sdim, sdim)),          # bonds_lin_0, feature part
        "w0d": init(ks[8], (1, sdim)),             # bonds_lin_0, distance col
        "b0": init(ks[9], (1, sdim)),
        "W1": init(ks[10], (sdim, num_bond_types)),
        "b1": init(ks[11], (1, num_bond_types)),
    }

    def run_case(kseed, N, G, compute_dtype, atol, rtol):
        kk = jax.random.split(kseed, 4)
        s = init(kk[0], (N, sdim), 1.0)
        v = init(kk[1], (N, 3, vdim), 1.0)
        p = init(kk[2], (N, 3), 1.0)
        batch = jnp.repeat(jnp.arange(G, dtype=jnp.int32), N // G)
        edge_index = _fc_edges(batch)
        e = init(kk[3], (edge_index.shape[1], edge_dim), 1.0)

        out = prediction_head_edge(params, s, v, p, e, batch, edge_index, G,
                                   compute_dtype=compute_dtype)
        jax.block_until_ready(out)

        rc, ra, rb = reference(params, s, v, p, e, batch, edge_index, G)
        assert jnp.allclose(out["coords_pred"], rc, atol=atol, rtol=rtol)
        assert jnp.allclose(out["atoms_pred"], ra, atol=atol, rtol=rtol)
        assert jnp.allclose(out["bonds_pred"], rb, atol=atol, rtol=rtol)

    # f32 path (tight tolerance); small graphs also exercise the partial
    # trailing edge block (E=24, te=16).
    run_case(ks[12], N=8, G=2, compute_dtype=jnp.float32, atol=2e-4, rtol=2e-4)
    # bf16-streamed path (halved HBM read bytes); larger graphs give 2-step
    # grids on both kernels (v7x megacore) with 16-row-aligned tiles.
    run_case(ks[13], N=64, G=2, compute_dtype=jnp.bfloat16, atol=1e-1, rtol=5e-2)

    print("KERNEL_OK")
</pallas_src>

<mosaic_0001>
module attributes {stable_mosaic.version = 11 : i64} {
  func.func @node_kernel(%arg0: i32, %arg1: memref<8x32xf32, #tpu.memory_space<vmem>>, %arg2: memref<8x51xf32, #tpu.memory_space<vmem>>, %arg3: memref<32x32xf32, #tpu.memory_space<vmem>>, %arg4: memref<1x32xf32, #tpu.memory_space<vmem>>, %arg5: memref<32x32xf32, #tpu.memory_space<vmem>>, %arg6: memref<32x16xf32, #tpu.memory_space<vmem>>, %arg7: memref<1x16xf32, #tpu.memory_space<vmem>>, %arg8: memref<51x16xf32, #tpu.memory_space<vmem>>, %arg9: memref<8x32xf32, #tpu.memory_space<vmem>>, %arg10: memref<8x16xf32, #tpu.memory_space<vmem>>) attributes {dimension_semantics = [#tpu.dimension_semantics<parallel>], iteration_bounds = array<i64: 1>, scalar_prefetch = 0 : i64, scratch_operands = 0 : i64, tpu.core_type = #tpu.core_type<tc>, window_params = [{transform_indices = @transform_0, window_bounds = array<i64: 8, 32>}, {transform_indices = @transform_1, window_bounds = array<i64: 8, 51>}, {pipeline_mode = #tpu.pipeline_mode<synchronous>, transform_indices = @transform_2, window_bounds = array<i64: 32, 32>}, {pipeline_mode = #tpu.pipeline_mode<synchronous>, transform_indices = @transform_3, window_bounds = array<i64: 1, 32>}, {pipeline_mode = #tpu.pipeline_mode<synchronous>, transform_indices = @transform_4, window_bounds = array<i64: 32, 32>}, {pipeline_mode = #tpu.pipeline_mode<synchronous>, transform_indices = @transform_5, window_bounds = array<i64: 32, 16>}, {pipeline_mode = #tpu.pipeline_mode<synchronous>, transform_indices = @transform_6, window_bounds = array<i64: 1, 16>}, {pipeline_mode = #tpu.pipeline_mode<synchronous>, transform_indices = @transform_7, window_bounds = array<i64: 51, 16>}, {transform_indices = @transform_8, window_bounds = array<i64: 8, 32>}, {transform_indices = @transform_9, window_bounds = array<i64: 8, 16>}]} {
    %c0 = arith.constant 0 : index
    %c0_0 = arith.constant 0 : index
    %0 = vector.load %arg1[%c0, %c0_0] : memref<8x32xf32, #tpu.memory_space<vmem>>, vector<8x32xf32>
    %c0_1 = arith.constant 0 : index
    %c0_2 = arith.constant 0 : index
    %1 = vector.load %arg3[%c0_1, %c0_2] : memref<32x32xf32, #tpu.memory_space<vmem>>, vector<32x32xf32>
    %cst = arith.constant dense<0.000000e+00> : vector<8x32xf32>
    %2 = tpu.matmul %0, %1, %cst {dimension_numbers = #tpu.dot_dimension_numbers<[1], [0], [0], [1], [0, 0, 1, 1], [], []>} : vector<8x32xf32>, vector<32x32xf32>, vector<8x32xf32> -> vector<8x32xf32>
    %c0_3 = arith.constant 0 : index
    %c0_4 = arith.constant 0 : index
    %3 = vector.load %arg4[%c0_3, %c0_4] : memref<1x32xf32, #tpu.memory_space<vmem>>, vector<1x32xf32>
    %4 = vector.broadcast %3 : vector<1x32xf32> to vector<8x32xf32>
    %5 = arith.addf %2, %4 : vector<8x32xf32>
    %6 = arith.negf %5 : vector<8x32xf32>
    %7 = math.exp %6 : vector<8x32xf32>
    %cst_5 = arith.constant 1.000000e+00 : f32
    %8 = vector.broadcast %cst_5 : f32 to vector<8x32xf32>
    %9 = arith.addf %8, %7 : vector<8x32xf32>
    %10 = arith.divf %8, %9 : vector<8x32xf32>
    %11 = arith.mulf %5, %10 : vector<8x32xf32>
    %c0_6 = arith.constant 0 : index
    %c0_7 = arith.constant 0 : index
    %12 = vector.load %arg5[%c0_6, %c0_7] : memref<32x32xf32, #tpu.memory_space<vmem>>, vector<32x32xf32>
    %cst_8 = arith.constant dense<0.000000e+00> : vector<8x32xf32>
    %13 = tpu.matmul %11, %12, %cst_8 {dimension_numbers = #tpu.dot_dimension_numbers<[1], [0], [0], [1], [0, 0, 1, 1], [], []>} : vector<8x32xf32>, vector<32x32xf32>, vector<8x32xf32> -> vector<8x32xf32>
    %c0_9 = arith.constant 0 : index
    %c0_10 = arith.constant 0 : index
    %14 = vector.load %arg9[%c0_9, %c0_10] : memref<8x32xf32, #tpu.memory_space<vmem>>, vector<8x32xf32>
    tpu.vector_store %arg9[%c0_9, %c0_10], %13 {strides = array<i32>} : memref<8x32xf32, #tpu.memory_space<vmem>>, vector<8x32xf32>,
    %c0_11 = arith.constant 0 : index
    %c0_12 = arith.constant 0 : index
    %15 = vector.load %arg6[%c0_11, %c0_12] : memref<32x16xf32, #tpu.memory_space<vmem>>, vector<32x16xf32>
    %cst_13 = arith.constant dense<0.000000e+00> : vector<8x16xf32>
    %16 = tpu.matmul %11, %15, %cst_13 {dimension_numbers = #tpu.dot_dimension_numbers<[1], [0], [0], [1], [0, 0, 1, 1], [], []>} : vector<8x32xf32>, vector<32x16xf32>, vector<8x16xf32> -> vector<8x16xf32>
    %c0_14 = arith.constant 0 : index
    %c0_15 = arith.constant 0 : index
    %17 = vector.load %arg7[%c0_14, %c0_15] : memref<1x16xf32, #tpu.memory_space<vmem>>, vector<1x16xf32>
    %18 = vector.broadcast %17 : vector<1x16xf32> to vector<8x16xf32>
    %19 = arith.addf %16, %18 : vector<8x16xf32>
    %c0_16 = arith.constant 0 : index
    %c0_17 = arith.constant 0 : index
    %20 = vector.load %arg2[%c0_16, %c0_17] : memref<8x51xf32, #tpu.memory_space<vmem>>, vector<8x51xf32>
    %c0_18 = arith.constant 0 : index
    %c0_19 = arith.constant 0 : index
    %21 = vector.load %arg8[%c0_18, %c0_19] : memref<51x16xf32, #tpu.memory_space<vmem>>, vector<51x16xf32>
    %cst_20 = arith.constant dense<0.000000e+00> : vector<8x16xf32>
    %22 = tpu.matmul %20, %21, %cst_20 {dimension_numbers = #tpu.dot_dimension_numbers<[1], [0], [0], [1], [0, 0, 1, 1], [], []>} : vector<8x51xf32>, vector<51x16xf32>, vector<8x16xf32> -> vector<8x16xf32>
    %23 = arith.addf %19, %22 : vector<8x16xf32>
    %c0_21 = arith.constant 0 : index
    %c0_22 = arith.constant 0 : index
    %24 = vector.load %arg10[%c0_21, %c0_22] : memref<8x16xf32, #tpu.memory_space<vmem>>, vector<8x16xf32>
    tpu.vector_store %arg10[%c0_21, %c0_22], %23 {strides = array<i32>} : memref<8x16xf32, #tpu.memory_space<vmem>>, vector<8x16xf32>,
    return
  }
  func.func @transform_0(%arg0: i32) -> (i32, i32) {
    %c0_i32 = arith.constant 0 : i32
    %c0_i32_0 = arith.constant 0 : i32
    return %arg0, %c0_i32 : i32, i32
  }
  func.func @transform_1(%arg0: i32) -> (i32, i32) {
    %c0_i32 = arith.constant 0 : i32
    %c0_i32_0 = arith.constant 0 : i32
    return %arg0, %c0_i32 : i32, i32
  }
  func.func @transform_2(%arg0: i32) -> (i32, i32) {
    %c0_i32 = arith.constant 0 : i32
    %c0_i32_0 = arith.constant 0 : i32
    %c0_i32_1 = arith.constant 0 : i32
    return %c0_i32, %c0_i32_0 : i32, i32
  }
  func.func @transform_3(%arg0: i32) -> (i32, i32) {
    %c0_i32 = arith.constant 0 : i32
    %c0_i32_0 = arith.constant 0 : i32
    %c0_i32_1 = arith.constant 0 : i32
    return %c0_i32, %c0_i32_0 : i32, i32
  }
  func.func @transform_4(%arg0: i32) -> (i32, i32) {
    %c0_i32 = arith.constant 0 : i32
    %c0_i32_0 = arith.constant 0 : i32
    %c0_i32_1 = arith.constant 0 : i32
    return %c0_i32, %c0_i32_0 : i32, i32
  }
  func.func @transform_5(%arg0: i32) -> (i32, i32) {
    %c0_i32 = arith.constant 0 : i32
    %c0_i32_0 = arith.constant 0 : i32
    %c0_i32_1 = arith.constant 0 : i32
    return %c0_i32, %c0_i32_0 : i32, i32
  }
  func.func @transform_6(%arg0: i32) -> (i32, i32) {
    %c0_i32 = arith.constant 0 : i32
    %c0_i32_0 = arith.constant 0 : i32
    %c0_i32_1 = arith.constant 0 : i32
    return %c0_i32, %c0_i32_0 : i32, i32
  }
  func.func @transform_7(%arg0: i32) -> (i32, i32) {
    %c0_i32 = arith.constant 0 : i32
    %c0_i32_0 = arith.constant 0 : i32
    %c0_i32_1 = arith.constant 0 : i32
    return %c0_i32, %c0_i32_0 : i32, i32
  }
  func.func @transform_8(%arg0: i32) -> (i32, i32) {
    %c0_i32 = arith.constant 0 : i32
    %c0_i32_0 = arith.constant 0 : i32
    return %arg0, %c0_i32 : i32, i32
  }
  func.func @transform_9(%arg0: i32) -> (i32, i32) {
    %c0_i32 = arith.constant 0 : i32
    %c0_i32_0 = arith.constant 0 : i32
    return %arg0, %c0_i32 : i32, i32
  }
}

</mosaic_0001>

<bundles_post_ra>
// kernel: tpu_custom_call.1
= control target key start
LH: loop header
LB: loop body
LE: loop exit
PB: predicated region body
PF: predicated region fallthrough
CT: control target
= control target key end

     0   :  { %15 = vsyncpa [#allocation3], 0  ;;  %s410_s0 = inlined_call_operand.vmem [shape: f32[8,32], index: 0, kind: input, shape index: {}]   ;;  %s411_s1 = inlined_call_operand.vmem [shape: f32[8,51], index: 1, kind: input, shape index: {}]   ;;  %s412_s2 = inlined_call_operand.vmem [shape: f32[32,32], index: 2, kind: input, shape index: {}]   ;;  %s413_s3 = inlined_call_operand.vmem [shape: f32[1,32], index: 3, kind: input, shape index: {}]   ;;  %s414_s4 = inlined_call_operand.vmem [shape: f32[32,32], index: 4, kind: input, shape index: {}]   ;;  %s415_s5 = inlined_call_operand.vmem [shape: f32[32,16], index: 5, kind: input, shape index: {}]   ;;  %s416_s6 = inlined_call_operand.vmem [shape: f32[1,16], index: 6, kind: input, shape index: {}]   ;;  %s417_s7 = inlined_call_operand.vmem [shape: f32[51,16], index: 7, kind: input, shape index: {}]   ;;  %s418_s8 = inlined_call_operand.hbm [shape: f32[8,32], index: 8, kind: output, shape index: {0}]   ;;  %s419_s9 = inlined_call_operand.hbm [shape: f32[8,16], index: 9, kind: output, shape index: {1}]  }
   0x1   :  { %v37_v0 = vld [vmem:[%s412_s2 + $0x18] sm:$0xff]  ;;  %v36_v1 = vld [vmem:[%s412_s2 + $0x10] sm:$0xff]  ;;  %v35_v2 = vld [vmem:[%s412_s2 + $0x8] sm:$0xff] }
   0x2   :  { %58 = vmatpush.msra.mxu0 %v37_v0 }
   0x3   :  { %16 = vsyncpa [#allocation5], 0  ;;  %v34_v3 = vld [vmem:[%s412_s2] sm:$0xff]  ;;  %vm42_vm0 = vcmask 261120   ;;  %v149_v5 = vld [vmem:[%s417_s7 + $0x30] sm:$0x7] }
   0x4   :  { %59 = vmatpush.msra.mxu0 %v36_v1  ;;  %v33_v4 = vld [vmem:[%s410_s0] sm:$0xff]  ;;  %vm154_vm1 = vcmask 1042432   ;;  %v148_v6 = vld [vmem:[%s417_s7 + $0x28] sm:$0xff]  ;;  %v89_v7 = vld [vmem:[%s414_s4 + $0x18] sm:$0xff]  ;;  %vm150_vm2 = vcmask 416768   ;;  %s188_s27 = sshll.u32 %s418_s8, 4  ;;  %s189_s27 = int_to_ptr.hbm [resolvable:$true] %s188_s27 }
   0x5   :  { %217 = vmatpush.msk.msra.mxu3 %vm154_vm1, %v149_v5  ;;  %v117_v8 = vld [vmem:[%s415_s5 + $0x18] sm:$0xff]  ;;  %v147_v9 = vld [vmem:[%s417_s7 + $0x20] sm:$0xff]  ;;  %105 = vmatpush.msra.mxu1 %v89_v7  ;;  %v88_v10 = vld [vmem:[%s414_s4 + $0x10] sm:$0xff]  ;;  %s280_s30 = smov [#allocation4]   ;;  %s199_s13 = sshll.u32 %s419_s9, 4  ;;  %vm179_vm7 = vcmask 130048   ;;  %s200_s13 = int_to_ptr.hbm [resolvable:$true] %s199_s13 }
   0x6   :  { %60 = vmatpush.msra.mxu0 %v35_v2  ;;  %134 = vmatpush.msra.mxu2 %v117_v8  ;;  %v116_v11 = vld [vmem:[%s415_s5 + $0x10] sm:$0xff]  ;;  %v146_v12 = vld [vmem:[%s417_s7 + $0x18] sm:$0xff]  ;;  %v221_v13 = vld [vmem:[%s413_s3] ss:$0 sm:$0xff]  ;;  %s197_s10 = sshll.u32 %s280_s30, 4  ;;  %s198_s10 = int_to_ptr.vmem [resolvable:$true] %s197_s10 }
   0x7   :  { %168 = vmatpush.msra.mxu3 %v148_v6  ;;  %106 = vmatpush.msra.mxu1 %v88_v10  ;;  %v87_v14 = vld [vmem:[%s414_s4 + $0x8] sm:$0xff]  ;;  %v145_v16 = vld [vmem:[%s417_s7 + $0x10] sm:$0xff]  ;;  %v86_v17 = vld [vmem:[%s414_s4] sm:$0xff] }
   0x8   :  { %61 = vmatpush.msra.mxu0 %v34_v3  ;;  %135 = vmatpush.msra.mxu2 %v116_v11  ;;  %v115_v15 = vld [vmem:[%s415_s5 + $0x8] sm:$0xff]  ;;  %v114_v18 = vld [vmem:[%s415_s5] sm:$0xff] }
   0x9   :  { %213 = vmatmul.msk.f32.vlgmr.msra.gmra.mxu0 %vm42_vm0, %v33_v4  ;;  %169 = vmatpush.msra.mxu3 %v147_v9  ;;  %v144_v19 = vld [vmem:[%s417_s7 + $0x8] sm:$0xff]  ;;  %v143_v22 = vld [vmem:[%s417_s7] sm:$0xff] }
   0xa   :  { %107 = vmatpush.msra.mxu1 %v87_v14  ;;  %136 = vmatpush.msra.mxu2 %v115_v15  ;;  %v142_v23 = vld [vmem:[%s411_s1] sm:$0xff]  ;;  %s279_s1 = smov [#allocation2]  }
   0xb   :  { %170 = vmatpush.msra.mxu3 %v146_v12  ;;  %s186_s4 = sshll.u32 %s279_s1, 4  ;;  %v222_v39 = vld [vmem:[%s416_s6] ss:$0 sm:$0xff]  ;;  %s187_s4 = int_to_ptr.vmem [resolvable:$true] %s186_s4 }
   0xc   :  { %108 = vmatpush.msra.mxu1 %v86_v17  ;;  %137 = vmatpush.msra.mxu2 %v114_v18 }
   0xd   :  { %171 = vmatpush.msra.mxu3 %v145_v16 }
   0xf   :  { %172 = vmatpush.msra.mxu3 %v144_v19 }
  0x11   :  { %173 = vmatpush.msra.mxu3 %v143_v22 }
  0x12   :  { %218 = vmatmul.msk.f32.vlgmr.msra.gmra.mxu3 %vm150_vm2, %v142_v23 }
  0x86   :  { %v63_v20 = vpop.f32.mrf.mxu0 }
  0x87   :  { %v64_v21 = vadd.f32 %v221_v13, %v63_v20 }
  0x89   :  { %v214_v24 = vmul.f32 -1.442695, %v64_v21 }
  0x8b   :  { %223 = vpow2.f32 %v214_v24 }
  0x91   :  { %v224_v25 = vpop.eup %223 }
  0x92   :  { %v69_v26 = vadd.f32 1.0, %v224_v25 }
  0x94   :  { %225 = vrcp.f32 %v69_v26  ;;  %v81_v30 = vand.u32 2147483648, %v69_v26  ;;  %v79_v32 = vand.u32 2147483647, %v69_v26  ;;  %vm75_vm4 = vweird.f32 %v69_v26 }
  0x95   :  { %v175_v41 = vpop.f32.mrf.mxu3 }
  0x96   :  { %v82_v34 = vor.u32 1.1754944e-38, %v81_v30  ;;  %vm80_vm6 = vcmp.eq.f32.partialorder %v79_v32, 8.507059e+37 }
  0x9a   :  { %v226_v27 = vpop.eup %225 }
  0x9b   :  { %v71_v28 = vmul.f32 %v226_v27, %v69_v26  ;;  %vm76_vm3 = vweird.f32 %v226_v27 }
  0x9c   :  { %vm77_vm5 = vmor %vm75_vm4, %vm76_vm3 }
  0x9d   :  { %v72_v29 = vsub.f32 1.0, %v71_v28 }
  0x9f   :  { %v73_v31 = vmul.f32 %v226_v27, %v72_v29 }
  0xa1   :  { %v74_v33 = vadd.f32 %v226_v27, %v73_v31 }
  0xa3   :  { %v78_v35 = vsel %vm77_vm5, %v226_v27, %v74_v33 }
  0xa4   :  { %v83_v36 = vsel %vm80_vm6, %v82_v34, %v78_v35 }
  0xa5   :  { %v85_v37 = vmul.f32 %v83_v36, %v64_v21 }
  0xa7   :  { %215 = vmatmul.msk.f32.vlgmr.msra.gmra.mxu1 %vm42_vm0, %v85_v37  ;;  %216 = vmatmul.msk.f32.vlgmr.msra.gmra.mxu2 %vm42_vm0, %v85_v37 }
 0x124   :  { %v110_v38 = vpop.f32.mrf.mxu1 }
 0x125   :  { %113 = vst.msk [vmem:[#allocation2] sm:$0xff] %vm42_vm0, %v110_v38 }
 0x126   :  { %191 = dma.vmem_to_hbm [thread:$0]  %s187_s4, 128, %s189_s27, [#allocation3]  }
 0x12a   :  { %v139_v40 = vpop.f32.mrf.mxu2 }
 0x12b   :  { %v140_v42 = vadd.f32 %v222_v39, %v139_v40 }
 0x12d   :  { %v178_v43 = vadd.f32 %v175_v41, %v140_v42 }
 0x12f   :  { %180 = vst.msk [vmem:[#allocation4] sm:$0xff] %vm179_vm7, %v178_v43 }
 0x130   :  { %202 = dma.vmem_to_hbm [thread:$0]  %s198_s10, 128, %s200_s13, [#allocation5]  }
 0x131   :  { %275 = dma.done.wait [#allocation3], 128  }
 0x132   :  { %276 = vsyncadd [#allocation3], 4294967168 }
 0x133   :  { %277 = dma.done.wait [#allocation5], 128  }
 0x134   :  { %278 = vsyncadd [#allocation5], 4294967168 }
 0x135   :  { %211 = vsyncpa [#allocation3], 1 }
 0x136   :  { %212 = vsyncpa [#allocation5], 1 }

</bundles_post_ra>
